<compile_context>
chip_gen: v7x
topology: tpu7x:2x2x1
jax: 0.10.0
libtpu: 0.0.40
codegen_flags: <defaults>
</compile_context>

<pallas_src>
import functools

import jax
import jax.numpy as jnp
import numpy as np
from jax import lax
from jax.experimental import pallas as pl
from jax.experimental.pallas import tpu as pltpu

_LANE = 128      # vreg lane width
_SUBLANE = 8     # f32 sublanes per vreg


def _round_up(a: int, b: int) -> int:
    return ((a + b - 1) // b) * b


def _beam_x_kernel(seed_ref, x_ref, *, radius, block_rows, lanes):
    """Fill x_ref (block_rows, lanes) with uniform f32 samples in [-radius, radius)."""
    pid = pl.program_id(0)

    # Global element index of every slot in this block (int32 counter).
    row = lax.broadcasted_iota(jnp.int32, (block_rows, lanes), 0)
    col = lax.broadcasted_iota(jnp.int32, (block_rows, lanes), 1)
    idx = (pid * block_rows + row) * lanes + col

    # Stateless counter-based PRNG: splitmix32-style finalizer over (idx, seed).
    h = idx.astype(jnp.uint32) + seed_ref[0].astype(jnp.uint32) * jnp.uint32(0x9E3779B9)
    h = h ^ (h >> 16)
    h = h * jnp.uint32(0x7FEB352D)
    h = h ^ (h >> 15)
    h = h * jnp.uint32(0x846CA68B)
    h = h ^ (h >> 16)

    # Mantissa trick: top 23 random bits -> f32 in [1, 2); fold the affine map:
    #   x = 2r*f - 3r  ==  -r + 2r*(f - 1)   in [-r, r)
    f = lax.bitcast_convert_type((h >> 9) | jnp.uint32(0x3F800000), jnp.float32)
    x_ref[...] = jnp.float32(2.0 * radius) * f - jnp.float32(3.0 * radius)


def parallel_beam_random(num_rays, radius, seed=0):
    """Pallas implementation of ParallelBeamRandom.forward.

    Returns (rays_origins, rays_vectors), each (num_rays, 2) float32.
    """
    n = int(num_rays)

    # Dense 2-D layout for the random x values: lanes up to 1024 wide (multiple
    # of 128), rows padded to a sublane multiple.
    lanes = min(8 * _LANE, _round_up(max(n, 1), _LANE))
    rows = _round_up(pl.cdiv(max(n, 1), lanes), _SUBLANE)

    # ~2 MiB of f32 output per grid step; double-buffered output stays ~4 MiB,
    # far below the scoped-VMEM limits of v5e/v6e/v7x.
    target_rows = max(_SUBLANE, (2 << 20) // (4 * lanes))
    block_rows = min(rows, _round_up(target_rows, _SUBLANE))
    rows = _round_up(rows, block_rows)
    grid = rows // block_rows

    seed_arr = jnp.asarray([seed], dtype=jnp.int32)
    kernel = functools.partial(_beam_x_kernel, radius=float(radius),
                               block_rows=block_rows, lanes=lanes)

    x2d = pl.pallas_call(
        kernel,
        out_shape=jax.ShapeDtypeStruct((rows, lanes), jnp.float32),
        grid_spec=pltpu.PrefetchScalarGridSpec(
            num_scalar_prefetch=1,              # seed lands in SMEM
            grid=(grid,),
            in_specs=[],                        # no tensor inputs
            out_specs=pl.BlockSpec((block_rows, lanes), lambda i, seed: (i, 0)),
        ),
        compiler_params=pltpu.CompilerParams(
            dimension_semantics=("parallel",),  # v7x: blocks shard across both TCs
        ),
        cost_estimate=pl.CostEstimate(
            flops=10 * rows * lanes,
            transcendentals=0,
            bytes_accessed=4 * rows * lanes,
        ),
    )(seed_arr)

    # Wrapper-side assembly of the module's outputs: the constant parts never
    # touch the kernel; XLA fuses / constant-folds these small ops.
    x = x2d.reshape(-1)[:n]
    rays_origins = jnp.stack([x, jnp.zeros_like(x)], axis=1)              # (n, 2)
    rays_vectors = jnp.broadcast_to(
        jnp.asarray([0.0, 1.0], dtype=jnp.float32), (n, 2))               # (n, 2)
    return rays_origins, rays_vectors


if __name__ == "__main__":
    radius = 5.0
    num_rays = 1000   # deliberately not a multiple of 8*128: exercises padding
    # jax.random.PRNGKey(0) used only to derive a deterministic int32 seed.
    seed = int(jax.random.randint(jax.random.PRNGKey(0), (), 0, 2**31 - 1))

    origins, vectors = parallel_beam_random(num_rays, radius, seed=seed)
    origins, vectors = jax.block_until_ready((origins, vectors))

    origins = np.asarray(origins)
    vectors = np.asarray(vectors)

    # Shape checks
    assert origins.shape == (num_rays, 2), origins.shape
    assert vectors.shape == (num_rays, 2), vectors.shape
    # y-column of origins is exactly zero
    np.testing.assert_array_equal(origins[:, 1], np.zeros(num_rays, np.float32))
    # x-column is uniform in [-radius, radius)
    assert np.all(origins[:, 0] >= -radius) and np.all(origins[:, 0] < radius)
    # draw is non-degenerate (uniform on [-r, r) has std ~ r/sqrt(3))
    assert np.std(origins[:, 0]) > 0.1 * radius
    # direction vectors are exactly [0, 1] for every ray
    np.testing.assert_array_equal(
        vectors, np.tile(np.array([0.0, 1.0], np.float32), (num_rays, 1))
    )

    print("KERNEL_OK")
</pallas_src>

<mosaic_0001>
module attributes {stable_mosaic.version = 11 : i64} {
  func.func @_beam_x_kernel(%arg0: i32, %arg1: memref<1xi32, #tpu.memory_space<smem>>, %arg2: memref<8x1024xf32, #tpu.memory_space<vmem>>) attributes {dimension_semantics = [#tpu.dimension_semantics<parallel>], iteration_bounds = array<i64: 1>, scalar_prefetch = 1 : i64, scratch_operands = 0 : i64, tpu.core_type = #tpu.core_type<tc>, window_params = [{transform_indices = @transform_0, window_bounds = array<i64: 8, 1024>}]} {
    %0 = tpu.iota {dimensions = array<i32: 0>} : vector<8x1024xi32>
    %1 = tpu.iota {dimensions = array<i32: 1>} : vector<8x1024xi32>
    %c8_i32 = arith.constant 8 : i32
    %2 = arith.muli %arg0, %c8_i32 : i32
    %3 = vector.broadcast %2 : i32 to vector<8x1024xi32>
    %4 = arith.addi %3, %0 : vector<8x1024xi32>
    %c1024_i32 = arith.constant 1024 : i32
    %5 = vector.broadcast %c1024_i32 : i32 to vector<8x1024xi32>
    %6 = arith.muli %4, %5 : vector<8x1024xi32>
    %7 = arith.addi %6, %1 : vector<8x1024xi32>
    %c0 = arith.constant 0 : index
    %8 = memref.load %arg1[%c0] : memref<1xi32, #tpu.memory_space<smem>>
    %c-1640531527_i32 = arith.constant -1640531527 : i32
    %9 = arith.muli %8, %c-1640531527_i32 : i32
    %10 = vector.broadcast %9 : i32 to vector<8x1024xi32>
    %11 = arith.addi %7, %10 : vector<8x1024xi32>
    %c16_i32 = arith.constant 16 : i32
    %12 = vector.broadcast %c16_i32 : i32 to vector<8x1024xi32>
    %13 = arith.shrui %11, %12 : vector<8x1024xi32>
    %14 = arith.xori %11, %13 : vector<8x1024xi32>
    %c2146121005_i32 = arith.constant 2146121005 : i32
    %15 = vector.broadcast %c2146121005_i32 : i32 to vector<8x1024xi32>
    %16 = arith.muli %14, %15 : vector<8x1024xi32>
    %c15_i32 = arith.constant 15 : i32
    %17 = vector.broadcast %c15_i32 : i32 to vector<8x1024xi32>
    %18 = arith.shrui %16, %17 : vector<8x1024xi32>
    %19 = arith.xori %16, %18 : vector<8x1024xi32>
    %c-2073254261_i32 = arith.constant -2073254261 : i32
    %20 = vector.broadcast %c-2073254261_i32 : i32 to vector<8x1024xi32>
    %21 = arith.muli %19, %20 : vector<8x1024xi32>
    %c16_i32_0 = arith.constant 16 : i32
    %22 = vector.broadcast %c16_i32_0 : i32 to vector<8x1024xi32>
    %23 = arith.shrui %21, %22 : vector<8x1024xi32>
    %24 = arith.xori %21, %23 : vector<8x1024xi32>
    %c9_i32 = arith.constant 9 : i32
    %25 = vector.broadcast %c9_i32 : i32 to vector<8x1024xi32>
    %26 = arith.shrui %24, %25 : vector<8x1024xi32>
    %c1065353216_i32 = arith.constant 1065353216 : i32
    %27 = vector.broadcast %c1065353216_i32 : i32 to vector<8x1024xi32>
    %28 = arith.ori %26, %27 : vector<8x1024xi32>
    %29 = tpu.bitcast %28 : vector<8x1024xi32> -> vector<8x1024xf32>
    %cst = arith.constant 1.000000e+01 : f32
    %30 = vector.broadcast %cst : f32 to vector<8x1024xf32>
    %31 = arith.mulf %30, %29 : vector<8x1024xf32>
    %cst_1 = arith.constant 1.500000e+01 : f32
    %32 = vector.broadcast %cst_1 : f32 to vector<8x1024xf32>
    %33 = arith.subf %31, %32 : vector<8x1024xf32>
    %c0_2 = arith.constant 0 : index
    %c0_3 = arith.constant 0 : index
    %34 = vector.load %arg2[%c0_2, %c0_3] : memref<8x1024xf32, #tpu.memory_space<vmem>>, vector<8x1024xf32>
    tpu.vector_store %arg2[%c0_2, %c0_3], %33 {strides = array<i32>} : memref<8x1024xf32, #tpu.memory_space<vmem>>, vector<8x1024xf32>,
    return
  }
  func.func @transform_0(%arg0: i32, %arg1: memref<1xi32, #tpu.memory_space<smem>>) -> (i32, i32) {
    %c0_i32 = arith.constant 0 : i32
    %c0_i32_0 = arith.constant 0 : i32
    return %arg0, %c0_i32 : i32, i32
  }
}

</mosaic_0001>

<bundles_post_ra>
// kernel: tpu_custom_call.1
= control target key start
LH: loop header
LB: loop body
LE: loop exit
PB: predicated region body
PF: predicated region fallthrough
CT: control target
= control target key end

     0   :  { %v8_v0 = vlaneseq  ;;  %s227_s0 = inlined_call_operand.<no memory space> [shape: s32[1], index: 0, kind: input, shape index: {}]   ;;  %s228_s1 = inlined_call_operand.hbm [shape: f32[8,1024], index: 1, kind: output, shape index: {}]  }
   0x1   :  { %s32_s8 = smul.u32 2654435769, %s227_s0 }
   0x2   :  { %7 = vsyncpa [#allocation5], 0  ;;  %v9_v1 = vshrl.u32 %v8_v0, 7  ;;  %v11_v2 = vand.u32 127, %v8_v0  ;;  %s201_s0 = smov [#allocation4]  }
   0x3   :  { %v33_v3 = vstv %s32_s8  ;;  %s160_s9 = sshll.u32 %s201_s0, 4  ;;  %s161_s9 = int_to_ptr.vmem [resolvable:$true] %s160_s9 }
   0x4   :  { %v22_v4 = vmul.u32 1024, %v9_v1  ;;  %v12_v5 = vadd.s32 128, %v11_v2  ;;  %v13_v6 = vadd.s32 256, %v11_v2  ;;  %v14_v7 = vadd.s32 384, %v11_v2  ;;  %s177_s10 = scalar_lea.vmem %s161_s9, 1024  ;;  %p182_p1 = scmp.lt.s32.totalorder %s161_s9, %s161_s9 }
   0x5   :  { %v15_v8 = vadd.s32 512, %v11_v2  ;;  %v16_v9 = vadd.s32 640, %v11_v2  ;;  %v17_v10 = vadd.s32 768, %v11_v2  ;;  %v18_v11 = vadd.s32 896, %v11_v2  ;;  %p178_p0 = scmp.ne.s32.totalorder %s161_s9, %s177_s10  ;;  %p183_p2 = scmp.lt.s32.totalorder %s177_s10, %s177_s10 }
   0x6   :  { %v23_v12 = vadd.s32 %v22_v4, %v11_v2  ;;  %v24_v13 = vadd.s32 %v22_v4, %v12_v5  ;;  %v25_v14 = vadd.s32 %v22_v4, %v13_v6  ;;  %v26_v15 = vadd.s32 %v22_v4, %v14_v7 }
   0x7   :  { %v27_v16 = vadd.s32 %v22_v4, %v15_v8  ;;  %v28_v17 = vadd.s32 %v22_v4, %v16_v9  ;;  %v29_v18 = vadd.s32 %v22_v4, %v17_v10  ;;  %v30_v19 = vadd.s32 %v22_v4, %v18_v11  ;;  %p184_p3 = por %p183_p2, %p182_p1 }
   0x8   :  { %v34_v20 = vadd.s32 %v33_v3, %v23_v12  ;;  %v35_v21 = vadd.s32 %v33_v3, %v24_v13  ;;  %v36_v22 = vadd.s32 %v33_v3, %v25_v14  ;;  %v37_v23 = vadd.s32 %v33_v3, %v26_v15 }
   0x9   :  { %v38_v24 = vadd.s32 %v33_v3, %v27_v16  ;;  %v39_v25 = vadd.s32 %v33_v3, %v28_v17  ;;  %v40_v26 = vadd.s32 %v33_v3, %v29_v18  ;;  %v41_v27 = vadd.s32 %v33_v3, %v30_v19  ;;  %p185_p4 = pnand %p184_p3, %p178_p0 }
   0xa   :  { %v42_v28 = vshrl.u32 %v34_v20, 16  ;;  %v43_v29 = vshrl.u32 %v35_v21, 16  ;;  %v44_v30 = vshrl.u32 %v36_v22, 16  ;;  %v45_v31 = vshrl.u32 %v37_v23, 16 }
   0xb   :  { %v46_v32 = vshrl.u32 %v38_v24, 16  ;;  %v47_v33 = vshrl.u32 %v39_v25, 16  ;;  %v48_v34 = vshrl.u32 %v40_v26, 16  ;;  %v49_v35 = vshrl.u32 %v41_v27, 16 }
   0xc   :  { %v50_v36 = vxor.u32 %v42_v28, %v34_v20  ;;  %v51_v37 = vxor.u32 %v43_v29, %v35_v21  ;;  %v52_v38 = vxor.u32 %v44_v30, %v36_v22  ;;  %v53_v39 = vxor.u32 %v45_v31, %v37_v23 }
   0xd   :  { %v54_v40 = vxor.u32 %v46_v32, %v38_v24  ;;  %v55_v41 = vxor.u32 %v47_v33, %v39_v25  ;;  %v56_v42 = vxor.u32 %v48_v34, %v40_v26  ;;  %v57_v43 = vxor.u32 %v49_v35, %v41_v27 }
   0xe   :  { %v58_v44 = vmul.u32 2146121005, %v50_v36  ;;  %v59_v45 = vmul.u32 2146121005, %v51_v37 }
   0xf   :  { %v60_v46 = vmul.u32 2146121005, %v52_v38  ;;  %v61_v47 = vmul.u32 2146121005, %v53_v39 }
  0x10   :  { %v66_v48 = vshrl.u32 %v58_v44, 15  ;;  %v67_v49 = vshrl.u32 %v59_v45, 15  ;;  %v62_v50 = vmul.u32 2146121005, %v54_v40  ;;  %v63_v51 = vmul.u32 2146121005, %v55_v41 }
  0x11   :  { %v68_v52 = vshrl.u32 %v60_v46, 15  ;;  %v69_v53 = vshrl.u32 %v61_v47, 15  ;;  %v64_v54 = vmul.u32 2146121005, %v56_v42  ;;  %v65_v55 = vmul.u32 2146121005, %v57_v43 }
  0x12   :  { %v74_v56 = vxor.u32 %v66_v48, %v58_v44  ;;  %v75_v57 = vxor.u32 %v67_v49, %v59_v45  ;;  %v70_v58 = vshrl.u32 %v62_v50, 15  ;;  %v71_v59 = vshrl.u32 %v63_v51, 15 }
  0x13   :  { %v76_v60 = vxor.u32 %v68_v52, %v60_v46  ;;  %v77_v61 = vxor.u32 %v69_v53, %v61_v47  ;;  %v72_v62 = vshrl.u32 %v64_v54, 15  ;;  %v73_v63 = vshrl.u32 %v65_v55, 15 }
  0x14   :  { %v82_v0 = vmul.u32 2221713035, %v74_v56  ;;  %v83_v1 = vmul.u32 2221713035, %v75_v57  ;;  %v78_v2 = vxor.u32 %v70_v58, %v62_v50  ;;  %v79_v3 = vxor.u32 %v71_v59, %v63_v51 }
  0x15   :  { %v84_v4 = vmul.u32 2221713035, %v76_v60  ;;  %v85_v5 = vmul.u32 2221713035, %v77_v61  ;;  %v80_v6 = vxor.u32 %v72_v62, %v64_v54  ;;  %v81_v7 = vxor.u32 %v73_v63, %v65_v55 }
  0x16   :  { %v90_v8 = vshrl.u32 %v82_v0, 16  ;;  %v91_v9 = vshrl.u32 %v83_v1, 16  ;;  %v86_v10 = vmul.u32 2221713035, %v78_v2  ;;  %v87_v11 = vmul.u32 2221713035, %v79_v3 }
  0x17   :  { %v92_v12 = vshrl.u32 %v84_v4, 16  ;;  %v93_v13 = vshrl.u32 %v85_v5, 16  ;;  %v88_v14 = vmul.u32 2221713035, %v80_v6  ;;  %v89_v15 = vmul.u32 2221713035, %v81_v7 }
  0x18   :  { %v98_v16 = vxor.u32 %v90_v8, %v82_v0  ;;  %v99_v17 = vxor.u32 %v91_v9, %v83_v1  ;;  %v94_v18 = vshrl.u32 %v86_v10, 16  ;;  %v95_v19 = vshrl.u32 %v87_v11, 16 }
  0x19   :  { %v100_v20 = vxor.u32 %v92_v12, %v84_v4  ;;  %v101_v21 = vxor.u32 %v93_v13, %v85_v5  ;;  %v96_v22 = vshrl.u32 %v88_v14, 16  ;;  %v97_v23 = vshrl.u32 %v89_v15, 16 }
  0x1a   :  { %v106_v24 = vshrl.u32 %v98_v16, 9  ;;  %v107_v25 = vshrl.u32 %v99_v17, 9  ;;  %v102_v26 = vxor.u32 %v94_v18, %v86_v10  ;;  %v103_v27 = vxor.u32 %v95_v19, %v87_v11 }
  0x1b   :  { %v108_v28 = vshrl.u32 %v100_v20, 9  ;;  %v109_v29 = vshrl.u32 %v101_v21, 9  ;;  %v104_v30 = vxor.u32 %v96_v22, %v88_v14  ;;  %v105_v31 = vxor.u32 %v97_v23, %v89_v15 }
  0x1c   :  { %v114_v32 = vor.u32 1065353216, %v106_v24  ;;  %v115_v33 = vor.u32 1065353216, %v107_v25  ;;  %v110_v34 = vshrl.u32 %v102_v26, 9  ;;  %v111_v35 = vshrl.u32 %v103_v27, 9 }
  0x1d   :  { %v116_v36 = vor.u32 1065353216, %v108_v28  ;;  %v117_v37 = vor.u32 1065353216, %v109_v29  ;;  %v112_v38 = vshrl.u32 %v104_v30, 9  ;;  %v113_v39 = vshrl.u32 %v105_v31, 9 }
  0x1e   :  { %v130_v40 = vmul.f32 10.0, %v114_v32  ;;  %v131_v41 = vmul.f32 10.0, %v115_v33  ;;  %v118_v42 = vor.u32 1065353216, %v110_v34  ;;  %v119_v43 = vor.u32 1065353216, %v111_v35 }
  0x1f   :  { %v132_v44 = vmul.f32 10.0, %v116_v36  ;;  %v133_v45 = vmul.f32 10.0, %v117_v37  ;;  %v120_v46 = vor.u32 1065353216, %v112_v38  ;;  %v121_v47 = vor.u32 1065353216, %v113_v39 }
  0x20   :  { %v168_v48 = vadd.f32 -15.0, %v130_v40  ;;  %v169_v49 = vadd.f32 -15.0, %v131_v41  ;;  %v134_v50 = vmul.f32 10.0, %v118_v42  ;;  %v135_v51 = vmul.f32 10.0, %v119_v43 }
  0x21   :  { %v170_v52 = vadd.f32 -15.0, %v132_v44  ;;  %v171_v53 = vadd.f32 -15.0, %v133_v45  ;;  %v136_v54 = vmul.f32 10.0, %v120_v46  ;;  %v137_v55 = vmul.f32 10.0, %v121_v47 }
  0x22   :  { %146 = vst [vmem:[#allocation4] sm:$0xff] %v168_v48  ;;  %147 = vst [vmem:[#allocation4 + $0x8] sm:$0xff] %v169_v49  ;;  %v172_v56 = vadd.f32 -15.0, %v134_v50  ;;  %v173_v57 = vadd.f32 -15.0, %v135_v51 }
  0x23   :  { %148 = vst [vmem:[#allocation4 + $0x10] sm:$0xff] %v170_v52  ;;  %149 = vst [vmem:[#allocation4 + $0x18] sm:$0xff] %v171_v53  ;;  %v174_v58 = vadd.f32 -15.0, %v136_v54  ;;  %v175_v59 = vadd.f32 -15.0, %v137_v55 }
  0x24   :  { %150 = vst [vmem:[#allocation4 + $0x20] sm:$0xff] %v172_v56  ;;  %151 = vst [vmem:[#allocation4 + $0x28] sm:$0xff] %v173_v57 }
  0x25   :  { %152 = vst [vmem:[#allocation4 + $0x30] sm:$0xff] %v174_v58  ;;  %153 = vst [vmem:[#allocation4 + $0x38] sm:$0xff] %v175_v59 }
  0x26   :  { %188 = shalt.err (!%p185_p4)
}
  0x27   :  { %s189_s13 = scalar_lea.hbm %s228_s1, 1024 }
  0x28   :  { %p190_p5 = scmp.ne.s32.totalorder %s228_s1, %s189_s13  ;;  %p193_p6 = scmp.lt.u32.totalorder %s189_s13, %s228_s1 }
  0x2a   :  { %p195_p7 = pnand %p193_p6, %p190_p5 }
  0x2c   :  { %198 = shalt.err (!%p195_p7)
}
  0x2d   :  { %163 = dma.vmem_to_hbm [thread:$0]  %s161_s9, 1024, %s228_s1, [#allocation5]  }
  0x2e   :  { %199 = dma.done.wait [#allocation5], 1024  }
  0x2f   :  { %200 = vsyncadd [#allocation5], 4294966272 }
  0x30   :  { %167 = vsyncpa [#allocation5], 1 }

</bundles_post_ra>
